<compile_context>
chip_gen: v6e
topology: v6e:2x2x1
jax: 0.10.0
libtpu: 0.0.40
codegen_flags: <defaults>
</compile_context>

<pallas_src>
import jax
import jax.numpy as jnp
from jax.experimental import pallas as pl
from jax.experimental.pallas import tpu as pltpu

# ----------------------- logical model dimensions ----------------------------
B = 256          # batch (multiple of B_TILE)
B_TILE = 128     # rows per grid step (multiple of 8 sublanes)
LAT = 8          # latent dim (decoder input)
DEC_H = 32       # decoder hidden
IMG = 64         # decoder output / dnn input ("image" flattened)
DNN_H = 32       # dnn hidden
NC = 10          # num classes (dnn output)

PAD = 128        # lane-aligned padded width for every feature axis


# ------------------------------- Pallas kernel --------------------------------
def modified_dnn_kernel(z_ref, w_ref, b_ref, out_ref):
    """One batch tile: fused decoder + dnn.

    z_ref:   (B_TILE, PAD)      bf16   latent, zero-padded beyond LAT
    w_ref:   (4, PAD, PAD)      bf16   stacked zero-padded weights W1..W4
    b_ref:   (4, PAD)           f32    stacked zero-padded biases  b1..b4
    out_ref: (B_TILE, PAD)      f32    logits, zero beyond NC
    """
    z = z_ref[...]                                   # bf16 (B_TILE, PAD)
    b_all = b_ref[...]                               # f32  (4, PAD)

    # ---- decoder fc1 + ReLU (f32 accumulate / f32 elementwise) ----
    h1 = jnp.dot(z, w_ref[0], preferred_element_type=jnp.float32) + b_all[0:1, :]
    h1 = jnp.maximum(h1, 0.0)

    # ---- decoder fc2 + Sigmoid ----
    x = jnp.dot(h1.astype(jnp.bfloat16), w_ref[1],
                preferred_element_type=jnp.float32) + b_all[1:2, :]
    x = jax.nn.sigmoid(x)

    # ---- dnn fc1 + ReLU ----
    h2 = jnp.dot(x.astype(jnp.bfloat16), w_ref[2],
                 preferred_element_type=jnp.float32) + b_all[2:3, :]
    h2 = jnp.maximum(h2, 0.0)

    # ---- dnn fc2 (logits) ----
    logits = jnp.dot(h2.astype(jnp.bfloat16), w_ref[3],
                     preferred_element_type=jnp.float32) + b_all[3:4, :]

    out_ref[...] = logits.astype(out_ref.dtype)      # lane-dense (B_TILE, 128) store


# --------------------------------- wrapper ------------------------------------
def modified_dnn_forward(z, packed_params, *, b_tile=B_TILE):
    """z: (B, LAT) f32.  Returns logits (B, NC) f32."""
    w_stack, b_stack = packed_params                 # (4,PAD,PAD) bf16, (4,PAD) f32
    batch = z.shape[0]
    assert batch % b_tile == 0

    # Zero-pad latent to a full 128-lane slab and cast to bf16 (MXU input dtype).
    z_pad = jnp.pad(z, ((0, 0), (0, PAD - LAT))).astype(jnp.bfloat16)

    out_pad = pl.pallas_call(
        modified_dnn_kernel,
        out_shape=jax.ShapeDtypeStruct((batch, PAD), jnp.float32),
        grid=(batch // b_tile,),
        in_specs=[
            # streamed activations: one batch tile per grid step
            pl.BlockSpec((b_tile, PAD), lambda i: (i, 0)),
            # parameters: block index constant in i -> DMA'd once, VMEM-resident
            pl.BlockSpec((4, PAD, PAD), lambda i: (0, 0, 0)),
            pl.BlockSpec((4, PAD), lambda i: (0, 0)),
        ],
        out_specs=pl.BlockSpec((b_tile, PAD), lambda i: (i, 0)),
        compiler_params=pltpu.CompilerParams(
            dimension_semantics=("parallel",)),       # shards batch tiles on v7x 2xTC
    )(z_pad, w_stack, b_stack)

    return out_pad[:, :NC]


# --------------------------- deterministic params ------------------------------
def init_params(key):
    keys = jax.random.split(key, 8)

    def linear(kw, kb, fan_in, fan_out):
        # PyTorch nn.Linear default init: U(-1/sqrt(fan_in), 1/sqrt(fan_in))
        bound = 1.0 / jnp.sqrt(fan_in)
        w = jax.random.uniform(kw, (fan_in, fan_out), jnp.float32, -bound, bound)
        b = jax.random.uniform(kb, (fan_out,), jnp.float32, -bound, bound)
        return w, b

    w1, b1 = linear(keys[0], keys[1], LAT, DEC_H)
    w2, b2 = linear(keys[2], keys[3], DEC_H, IMG)
    w3, b3 = linear(keys[4], keys[5], IMG, DNN_H)
    w4, b4 = linear(keys[6], keys[7], DNN_H, NC)
    return (w1, b1, w2, b2, w3, b3, w4, b4)


def pack_params(params):
    """Zero-pad every layer to [PAD, PAD] / [PAD] and stack into two slabs."""
    w1, b1, w2, b2, w3, b3, w4, b4 = params

    def pad_w(w):
        fi, fo = w.shape
        return jnp.zeros((PAD, PAD), jnp.float32).at[:fi, :fo].set(w)

    def pad_b(b):
        return jnp.zeros((PAD,), jnp.float32).at[: b.shape[-1]].set(b)

    w_stack = jnp.stack([pad_w(w1), pad_w(w2), pad_w(w3), pad_w(w4)]).astype(jnp.bfloat16)
    b_stack = jnp.stack([pad_b(b1), pad_b(b2), pad_b(b3), pad_b(b4)])  # f32
    return w_stack, b_stack


# ------------------------------ pure-JAX reference ------------------------------
def reference_forward(z, params):
    """Same math with matching bf16-input / f32-accumulate matmuls, no padding."""
    w1, b1, w2, b2, w3, b3, w4, b4 = params

    def mm(a, w):
        return jnp.dot(a.astype(jnp.bfloat16), w.astype(jnp.bfloat16),
                       preferred_element_type=jnp.float32)

    h1 = jnp.maximum(mm(z, w1) + b1, 0.0)
    x = jax.nn.sigmoid(mm(h1, w2) + b2)
    h2 = jnp.maximum(mm(x, w3) + b3, 0.0)
    return mm(h2, w4) + b4


if __name__ == "__main__":
    key = jax.random.PRNGKey(0)
    k_z, k_p = jax.random.split(key)

    z = jax.random.normal(k_z, (B, LAT), jnp.float32)
    params = init_params(k_p)
    packed = pack_params(params)

    out = modified_dnn_forward(z, packed)
    out = jax.block_until_ready(out)

    ref = reference_forward(z, params)
    assert out.shape == (B, NC), out.shape
    # bf16 matmul inputs (matched in the reference); tolerance covers
    # accumulation-order differences between padded/unpadded contractions.
    assert jnp.allclose(out, ref, atol=1e-3, rtol=1e-3), "mismatch vs reference"

    print("KERNEL_OK")
</pallas_src>

<mosaic_0001>
module attributes {stable_mosaic.version = 11 : i64} {
  func.func @modified_dnn_kernel(%arg0: i32, %arg1: memref<128x128xbf16, #tpu.memory_space<vmem>>, %arg2: memref<4x128x128xbf16, #tpu.memory_space<vmem>>, %arg3: memref<4x128xf32, #tpu.memory_space<vmem>>, %arg4: memref<128x128xf32, #tpu.memory_space<vmem>>) attributes {dimension_semantics = [#tpu.dimension_semantics<parallel>], iteration_bounds = array<i64: 2>, scalar_prefetch = 0 : i64, scratch_operands = 0 : i64, tpu.core_type = #tpu.core_type<tc>, window_params = [{transform_indices = @transform_0, window_bounds = array<i64: 128, 128>}, {pipeline_mode = #tpu.pipeline_mode<synchronous>, transform_indices = @transform_1, window_bounds = array<i64: 4, 128, 128>}, {pipeline_mode = #tpu.pipeline_mode<synchronous>, transform_indices = @transform_2, window_bounds = array<i64: 4, 128>}, {transform_indices = @transform_3, window_bounds = array<i64: 128, 128>}]} {
    %c0 = arith.constant 0 : index
    %c0_0 = arith.constant 0 : index
    %0 = vector.load %arg1[%c0, %c0_0] : memref<128x128xbf16, #tpu.memory_space<vmem>>, vector<128x128xbf16>
    %c0_1 = arith.constant 0 : index
    %c0_2 = arith.constant 0 : index
    %1 = vector.load %arg3[%c0_1, %c0_2] : memref<4x128xf32, #tpu.memory_space<vmem>>, vector<4x128xf32>
    %c0_3 = arith.constant 0 : index
    %c0_4 = arith.constant 0 : index
    %c0_5 = arith.constant 0 : index
    %2 = vector.load %arg2[%c0_3, %c0_4, %c0_5] : memref<4x128x128xbf16, #tpu.memory_space<vmem>>, vector<1x128x128xbf16>
    %3 = vector.shape_cast %2 : vector<1x128x128xbf16> to vector<128x128xbf16>
    %cst = arith.constant dense<0.000000e+00> : vector<128x128xf32>
    %4 = tpu.matmul %0, %3, %cst {dimension_numbers = #tpu.dot_dimension_numbers<[1], [0], [0], [1], [0, 0, 1, 1], [], []>} : vector<128x128xbf16>, vector<128x128xbf16>, vector<128x128xf32> -> vector<128x128xf32>
    %5 = vector.extract_strided_slice %1 {offsets = [0, 0], sizes = [1, 128], strides = [1, 1]} : vector<4x128xf32> to vector<1x128xf32>
    %6 = vector.broadcast %5 : vector<1x128xf32> to vector<128x128xf32>
    %7 = arith.addf %4, %6 : vector<128x128xf32>
    %cst_6 = arith.constant 0.000000e+00 : f32
    %8 = vector.broadcast %cst_6 : f32 to vector<128x128xf32>
    %9 = arith.maximumf %7, %8 : vector<128x128xf32>
    %10 = arith.truncf %9 : vector<128x128xf32> to vector<128x128xbf16>
    %c1 = arith.constant 1 : index
    %c0_7 = arith.constant 0 : index
    %c0_8 = arith.constant 0 : index
    %11 = vector.load %arg2[%c1, %c0_7, %c0_8] : memref<4x128x128xbf16, #tpu.memory_space<vmem>>, vector<1x128x128xbf16>
    %12 = vector.shape_cast %11 : vector<1x128x128xbf16> to vector<128x128xbf16>
    %cst_9 = arith.constant dense<0.000000e+00> : vector<128x128xf32>
    %13 = tpu.matmul %10, %12, %cst_9 {dimension_numbers = #tpu.dot_dimension_numbers<[1], [0], [0], [1], [0, 0, 1, 1], [], []>} : vector<128x128xbf16>, vector<128x128xbf16>, vector<128x128xf32> -> vector<128x128xf32>
    %14 = vector.extract_strided_slice %1 {offsets = [1, 0], sizes = [1, 128], strides = [1, 1]} : vector<4x128xf32> to vector<1x128xf32>
    %15 = vector.broadcast %14 : vector<1x128xf32> to vector<128x128xf32>
    %16 = arith.addf %13, %15 : vector<128x128xf32>
    %17 = arith.negf %16 : vector<128x128xf32>
    %18 = math.exp %17 : vector<128x128xf32>
    %cst_10 = arith.constant 1.000000e+00 : f32
    %19 = vector.broadcast %cst_10 : f32 to vector<128x128xf32>
    %20 = arith.addf %19, %18 : vector<128x128xf32>
    %21 = arith.divf %19, %20 : vector<128x128xf32>
    %22 = arith.truncf %21 : vector<128x128xf32> to vector<128x128xbf16>
    %c2 = arith.constant 2 : index
    %c0_11 = arith.constant 0 : index
    %c0_12 = arith.constant 0 : index
    %23 = vector.load %arg2[%c2, %c0_11, %c0_12] : memref<4x128x128xbf16, #tpu.memory_space<vmem>>, vector<1x128x128xbf16>
    %24 = vector.shape_cast %23 : vector<1x128x128xbf16> to vector<128x128xbf16>
    %cst_13 = arith.constant dense<0.000000e+00> : vector<128x128xf32>
    %25 = tpu.matmul %22, %24, %cst_13 {dimension_numbers = #tpu.dot_dimension_numbers<[1], [0], [0], [1], [0, 0, 1, 1], [], []>} : vector<128x128xbf16>, vector<128x128xbf16>, vector<128x128xf32> -> vector<128x128xf32>
    %26 = vector.extract_strided_slice %1 {offsets = [2, 0], sizes = [1, 128], strides = [1, 1]} : vector<4x128xf32> to vector<1x128xf32>
    %27 = vector.broadcast %26 : vector<1x128xf32> to vector<128x128xf32>
    %28 = arith.addf %25, %27 : vector<128x128xf32>
    %cst_14 = arith.constant 0.000000e+00 : f32
    %29 = vector.broadcast %cst_14 : f32 to vector<128x128xf32>
    %30 = arith.maximumf %28, %29 : vector<128x128xf32>
    %31 = arith.truncf %30 : vector<128x128xf32> to vector<128x128xbf16>
    %c3 = arith.constant 3 : index
    %c0_15 = arith.constant 0 : index
    %c0_16 = arith.constant 0 : index
    %32 = vector.load %arg2[%c3, %c0_15, %c0_16] : memref<4x128x128xbf16, #tpu.memory_space<vmem>>, vector<1x128x128xbf16>
    %33 = vector.shape_cast %32 : vector<1x128x128xbf16> to vector<128x128xbf16>
    %cst_17 = arith.constant dense<0.000000e+00> : vector<128x128xf32>
    %34 = tpu.matmul %31, %33, %cst_17 {dimension_numbers = #tpu.dot_dimension_numbers<[1], [0], [0], [1], [0, 0, 1, 1], [], []>} : vector<128x128xbf16>, vector<128x128xbf16>, vector<128x128xf32> -> vector<128x128xf32>
    %35 = vector.extract_strided_slice %1 {offsets = [3, 0], sizes = [1, 128], strides = [1, 1]} : vector<4x128xf32> to vector<1x128xf32>
    %36 = vector.broadcast %35 : vector<1x128xf32> to vector<128x128xf32>
    %37 = arith.addf %34, %36 : vector<128x128xf32>
    %c0_18 = arith.constant 0 : index
    %c0_19 = arith.constant 0 : index
    %38 = vector.load %arg4[%c0_18, %c0_19] : memref<128x128xf32, #tpu.memory_space<vmem>>, vector<128x128xf32>
    tpu.vector_store %arg4[%c0_18, %c0_19], %37 {strides = array<i32>} : memref<128x128xf32, #tpu.memory_space<vmem>>, vector<128x128xf32>,
    return
  }
  func.func @transform_0(%arg0: i32) -> (i32, i32) {
    %c0_i32 = arith.constant 0 : i32
    %c0_i32_0 = arith.constant 0 : i32
    return %arg0, %c0_i32 : i32, i32
  }
  func.func @transform_1(%arg0: i32) -> (i32, i32, i32) {
    %c0_i32 = arith.constant 0 : i32
    %c0_i32_0 = arith.constant 0 : i32
    %c0_i32_1 = arith.constant 0 : i32
    %c0_i32_2 = arith.constant 0 : i32
    return %c0_i32, %c0_i32_0, %c0_i32_1 : i32, i32, i32
  }
  func.func @transform_2(%arg0: i32) -> (i32, i32) {
    %c0_i32 = arith.constant 0 : i32
    %c0_i32_0 = arith.constant 0 : i32
    %c0_i32_1 = arith.constant 0 : i32
    return %c0_i32, %c0_i32_0 : i32, i32
  }
  func.func @transform_3(%arg0: i32) -> (i32, i32) {
    %c0_i32 = arith.constant 0 : i32
    %c0_i32_0 = arith.constant 0 : i32
    return %arg0, %c0_i32 : i32, i32
  }
}

</mosaic_0001>

<bundles_post_ra>
// kernel: tpu_custom_call.1
= control target key start
LH: loop header
LB: loop body
LE: loop exit
PB: predicated region body
PF: predicated region fallthrough
CT: control target
= control target key end

     0   :  { %8 = vsyncpa [#allocation3], 0  ;;  %s2096_s0 = inlined_call_operand.hbm [shape: bf16[256,128], index: 0, kind: input, shape index: {}]   ;;  %s2097_s1 = inlined_call_operand.hbm [shape: bf16[4,128,128], index: 1, kind: input, shape index: {}]   ;;  %s2098_s2 = inlined_call_operand.hbm [shape: f32[4,128], index: 2, kind: input, shape index: {}]   ;;  %s2099_s3 = inlined_call_operand.hbm [shape: f32[256,128], index: 3, kind: output, shape index: {}]  }
   0x1   :  { %10 = vsyncpa [#allocation3 + $0x1], 0 }
   0x2   :  { %11 = vsyncpa [#allocation6], 0 }
   0x3   :  { %12 = vsyncpa [#allocation4], 0 }
   0x4   :  { %14 = vsyncpa [#allocation4 + $0x1], 0  ;;  %s1842_s12 = smov 0   ;;  %s1844_s13 = smov 0  }
   0x5   :  { %s1846_s14 = smov 0   ;;  %s1848_s15 = smov 0  }
   0x6 LB: > { %s1863_s16 = sadd.s32 4294967295, %s1812_s15   ;;  %s1221_s17 = sadd.s32 4294967294, %s1812_s15   ;;  %s1812_s15 = sphi %s1848_s15, %s2120_s15   ;;  %s1808_s14 = sphi %s1846_s14, %s2119_s14   ;;  %s1804_s13 = sphi %s1844_s13, %s2118_s13   ;;  %s1800_s12 = sphi %s1842_s12, %s2117_s12  }
   0x7   : > { %p40_p0 = scmp.ne.s32.totalorder %s1804_s13, %s1800_s12  ;;  %p2100_p1 = scmp.eq.s32.totalorder %s1863_s16, 0 }
   0x8   : > { %p106_p2 = scmp.eq.s32.totalorder %s1863_s16, 1  ;;  %p112_p3 = scmp.eq.s32.totalorder %s1221_s17, 1 }
   0x9   : > { %p1872_p4 = por %p2100_p1, %p40_p0  ;;  %p1222_p5 = scmp.ge.s32.totalorder %s1812_s15, 1 }
   0xa   : > { %p1877_p6 = por %p112_p3, %p40_p0  ;;  %p119_p7 = scmp.lt.s32.totalorder %s1812_s15, 3 }
   0xb   : > { %s2104_s18 = scalar_select %p1872_p4, 1, 0 }
   0xc   : > { %s2105_s19 = scalar_select %p1877_p6, 1, 0 }
   0xd   : > { %p1882_p8 = pnand %p1222_p5, %p119_p7  ;;  %s1814_s21 = smov [#allocation5]  }
   0xe   : > { %s131_s22 = sshll.u32 %s1814_s21, 4  ;;  %s1815_s24 = smov [#allocation7]   ;;  %s132_s22 = int_to_ptr.vmem [resolvable:$true] %s131_s22 }
   0xf   : > { %s2106_s20 = scalar_select %p1882_p8, 1, 0 }
  0x10   : > { %p1501_p9 = pneg %p1882_p8  ;;  %s145_s25 = sshll.u32 %s1815_s24, 4  ;;  %s146_s25 = int_to_ptr.vmem [resolvable:$true] %s145_s25 }
  0x11   : > { %s1675_s26 = scalar_lea.vmem %s132_s22, 4096  ;;  %p1683_p5 = scmp.lt.s32.totalorder %s132_s22, %s132_s22 }
  0x12   : > { %p1891_p11 = pnand %p1501_p9, %p2100_p1  ;;  %p1676_p13 = scmp.ne.s32.totalorder %s132_s22, %s1675_s26 }
  0x13   : > { %p1684_p7 = scmp.lt.s32.totalorder %s1675_s26, %s1675_s26 }
  0x14   : > { %p1666_p12 = pneg %p1891_p11 }
  0x15   : > { %p1685_p10 = por %p1684_p7, %p1683_p5 }
  0x16   : > { %p1678_p0 = pnand %p1676_p13, %p1666_p12 }
  0x18   : > { %p1679_p3 = pneg %p1678_p0 }
  0x1a   : > { %p1686_p9 = pnand %p1685_p10, %p1679_p3 }
  0x1c   : > { %1689 = shalt.err (!%p1686_p9)
}
  0x1d   : > { %s1816_s27 = smov 64   ;;  %s1817_s28 = smov 4  }
  0x1e   : > { %1504 = dma.hbm_to_vmem [thread:$0]  (!%p1891_p11), %s2097_s1, 4096, %s132_s22, [#allocation6], %s1816_s27, %s1816_s27, %s1817_s28  }
  0x1f   : > { %s1701_s4 = scalar_lea.vmem %s146_s25, 64  ;;  %p1709_p10 = scmp.lt.s32.totalorder %s146_s25, %s146_s25 }
  0x20   : > { %p1702_p13 = scmp.ne.s32.totalorder %s146_s25, %s1701_s4  ;;  %p1710_p3 = scmp.lt.s32.totalorder %s1701_s4, %s1701_s4 }
  0x22   : > { %p1704_p0 = pnand %p1702_p13, %p1666_p12  ;;  %p1711_p7 = por %p1710_p3, %p1709_p10 }
  0x24   : > { %p1705_p5 = pneg %p1704_p0 }
  0x26   : > { %p1712_p9 = pnand %p1711_p7, %p1705_p5 }
  0x28   : > { %1715 = shalt.err (!%p1712_p9)
}
  0x29   : > { %1507 = dma.hbm_to_vmem [thread:$0]  (!%p1891_p11), %s2098_s2, 64, %s146_s25, [#allocation6]  }
  0x2a   : > { %s1917_s7 = sadd.s32 1, %s1812_s15   ;;  %s27_s8 = sadd.s32 1, %s1808_s14 }
  0x2b   : > { %s24_s9 = ssub.s32 %s1812_s15, %s1917_s7  ;;  %p34_p12 = scmp.ne.s32.totalorder %s1808_s14, %s1804_s13 }
  0x2c   : > { %p25_p13 = scmp.eq.s32.totalorder %s24_s9, 0  ;;  %p35_p0 = scmp.eq.s32.totalorder %s1812_s15, 0 }
  0x2d   : > { %p1927_p5 = por %p106_p2, %p34_p12  ;;  %p1518_p10 = scmp.lt.s32.totalorder %s1812_s15, 2 }
  0x2e   : > { %s1933_s11 = scalar_select %p25_p13, %s1808_s14, %s27_s8  }
  0x2f   : > { %s2108_s10 = scalar_select %p1927_p5, 1, 0 }
  0x30   : > { %p36_p3 = por %p35_p0, %p34_p12  ;;  %s156_s17 = sand.u32 1, %s1808_s14  }
  0x31   : > { %s1226_s21 = sshll.u32 %s156_s17, 6  ;;  %s1295_s22 = sshll.u32 %s1812_s15, 10 }
  0x32   : > { %s1940_s25 = scalar_lea.hbm %s2096_s0, %s1295_s22  ;;  %s160_s26 = scalar_lea.vmem [#allocation2], %s1226_s21 }
  0x33   : > { %s167_s29 = sshll.u32 %s160_s26, 4  ;;  %p1944_p2 = pnand %p1518_p10, %p36_p3  ;;  %s1942_s29 = int_to_ptr.vmem [resolvable:$true] %s167_s29 }
  0x34   : > { %s1948_s4 = scalar_lea.sflag [#allocation3], %s156_s17  ;;  %s1716_s5 = scalar_lea.hbm %s1940_s25, 1024 }
  0x35   : > { %p1717_p11 = scmp.ne.s32.totalorder %s1940_s25, %s1716_s5  ;;  %p1718_p7 = pneg %p1944_p2 }
  0x36   : > { %s1721_s9 = scalar_lea.hbm %s2096_s0, 2048  ;;  %p1722_p13 = scmp.lt.s32.totalorder %s1940_s25, %s2096_s0 }
  0x37   : > { %p1719_p9 = pnand %p1718_p7, %p1717_p11  ;;  %p1723_p0 = scmp.lt.s32.totalorder %s1721_s9, %s1716_s5 }
  0x39   : > { %p1720_p12 = pneg %p1719_p9  ;;  %p1724_p10 = por %p1723_p0, %p1722_p13 }
  0x3b   : > { %p1725_p3 = pnand %p1724_p10, %p1720_p12 }
  0x3d   : > { %1728 = shalt.err (!%p1725_p3)
}
  0x3e   : > { %s1729_s17 = scalar_lea.vmem %s1942_s29, 1024  ;;  %s1818_s23 = smov [#allocation2]  }
  0x3f   : > { %p1730_p1 = scmp.ne.s32.totalorder %s1942_s29, %s1729_s17  ;;  %s1734_s24 = sshll.u32 %s1818_s23, 4  ;;  %s1735_s24 = int_to_ptr.vmem [resolvable:$false] %s1734_s24 }
  0x40   : > { %s1736_s26 = scalar_lea.vmem %s1735_s24, 2048  ;;  %p1737_p9 = scmp.lt.s32.totalorder %s1942_s29, %s1735_s24 }
  0x41   : > { %p1732_p6 = pnand %p1730_p1, %p1718_p7  ;;  %p1738_p5 = scmp.lt.s32.totalorder %s1736_s26, %s1729_s17 }
  0x43   : > { %p1733_p11 = pneg %p1732_p6  ;;  %p1739_p4 = por %p1738_p5, %p1737_p9 }
  0x45   : > { %p1740_p8 = pnand %p1739_p4, %p1733_p11 }
  0x47   : > { %1743 = shalt.err (!%p1740_p8)
}
  0x48   : > { %1511 = dma.hbm_to_vmem [thread:$0]  (!%p1944_p2), %s1940_s25, 1024, %s1942_s29, %s1948_s4, %s1816_s27, %s1816_s27, %s1817_s28  }
  0x49   : > { %p2110_p1 = scmp.ne.s32.totalorder %s2106_s20, 0 }
  0x4a   : > { %s1975_s5 = sand.u32 (!%p2110_p1), 1, %s1804_s13   ;;  %p2111_p4 = scmp.ne.s32.totalorder (!%p2110_p1), %s2104_s18, 0 }
  0x4b   : > { %179 = sbr.rel (%p2110_p1) target bundleno = 1005 (0x3ed), region = 32  ;;  %s1230_s6 = sshll.u32 (!%p2110_p1), %s1975_s5, 6 }
  0x4c   : > { %s182_s8 = scalar_lea.sflag (!%p2110_p1), [#allocation3], %s1975_s5  ;;  %s1979_s9 = scalar_lea.vmem (!%p2110_p1), [#allocation2], %s1230_s6 }
  0x50   : > { %1787 = dma.done.wait (%p2111_p4), %s182_s8, 1024  }
  0x51   : > { %1789 = vsyncadd (%p2111_p4), %s182_s8, 4294966272  ;;  %p2112_p6 = scmp.eq.s32.totalorder %s1863_s16, 0 }
  0x53   : > { %1791 = dma.done.wait (%p2112_p6), [#allocation6], 4160   ;;  %p2113_p8 = pmov %p2112_p6 }
  0x54   : > { %v1560_v0 = vld [vmem:[#allocation5 + $0x38] sm:$0xff]   ;;  %v1561_v1 = vld [vmem:[#allocation5 + $0x30] sm:$0xff]   ;;  %v1562_v2 = vld [vmem:[#allocation5 + $0x28] sm:$0xff]   ;;  %v252_v24 = vlaneseq  ;;  %s1233_s18 = sshll.u32 %s1975_s5, 7  ;;  %s1296_s27 = sshll.u32 %s1863_s16, 11 }
  0x55   : > { %1793 = vsyncadd (%p2113_p8), [#allocation6], 4294963136  ;;  %1361 = vmatprep.subr.bf16.mxu0 %v1560_v0  ;;  %v1563_v3 = vld [vmem:[#allocation5 + $0x20] sm:$0xff]   ;;  %v1564_v5 = vld [vmem:[#allocation5 + $0x18] sm:$0xff]   ;;  %s2028_s20 = scalar_lea.vmem [#allocation8], %s1233_s18  ;;  %s2049_s30 = scalar_lea.hbm %s2099_s3, %s1296_s27 }
  0x56   : > { %1362 = vmatpush3.bf16.msra.mxu0 %v1560_v0  ;;  %v1568_v4 = vld [vmem:[%s1979_s9] sm:$0xff]   ;;  %v1565_v6 = vld [vmem:[#allocation5 + $0x10] sm:$0xff]   ;;  %v1576_v7 = vld [vmem:[#allocation5 + $0x78] sm:$0xff]   ;;  %v1997_v25 = vshrl.u32 %v252_v24, 7  ;;  %s1129_s28 = sshll.u32 %s2028_s20, 4  ;;  %s1116_s4 = scalar_lea.sflag [#allocation4], %s1975_s5  ;;  %s2051_s28 = int_to_ptr.vmem [resolvable:$true] %s1129_s28 }
  0x57   : > { %1363 = vmatprep.subr.bf16.mxu0 %v1561_v1  ;;  %1377 = vmatprep.mubr.bf16.mxu0 %v1568_v4  ;;  %v1577_v8 = vld [vmem:[#allocation5 + $0x70] sm:$0xff]   ;;  %v1566_v9 = vld [vmem:[#allocation5 + $0x8] sm:$0xff]   ;;  %v1567_v11 = vld [vmem:[#allocation5] sm:$0xff]   ;;  %s1744_s16 = scalar_lea.vmem %s2051_s28, 2048  ;;  %p2114_p2 = scmp.ne.s32.totalorder %s2108_s10, 0 }
  0x58   : > { %1393 = vmatprep.subr.bf16.mxu1 %v1576_v7  ;;  %v1578_v10 = vld [vmem:[#allocation5 + $0x68] sm:$0xff]   ;;  %v1579_v12 = vld [vmem:[#allocation5 + $0x60] sm:$0xff]   ;;  %v1580_v13 = vld [vmem:[#allocation5 + $0x58] sm:$0xff]   ;;  %v254_v26 = vsub.s32 0, %v1997_v25  ;;  %p1745_p5 = scmp.ne.s32.totalorder %s2051_s28, %s1744_s16  ;;  %s1819_s21 = smov [#allocation8]  }
  0x59   : > { %1394 = vmatpush3.bf16.msra.mxu1 %v1576_v7  ;;  %v1569_v14 = vld [vmem:[%s1979_s9 + $0x8] sm:$0xff]   ;;  %v1570_v15 = vld [vmem:[%s1979_s9 + $0x10] sm:$0xff]   ;;  %v1571_v16 = vld [vmem:[%s1979_s9 + $0x18] sm:$0xff]   ;;  %s1748_s22 = sshll.u32 %s1819_s21, 4  ;;  %s1749_s22 = int_to_ptr.vmem [resolvable:$false] %s1748_s22 }
  0x5a   : > { %1364 = vmatpush3.bf16.msra.mxu0 %v1561_v1  ;;  %1395 = vmatprep.subr.bf16.mxu1 %v1577_v8  ;;  %v1572_v17 = vld [vmem:[%s1979_s9 + $0x20] sm:$0xff]   ;;  %v1573_v18 = vld [vmem:[%s1979_s9 + $0x28] sm:$0xff]   ;;  %v1574_v19 = vld [vmem:[%s1979_s9 + $0x30] sm:$0xff]   ;;  %p1746_p7 = pnand %p1745_p5, %p2114_p2  ;;  %s1750_s17 = scalar_lea.vmem %s1749_s22, 4096 }
  0x5b   : > { %1365 = vmatprep.subr.bf16.mxu0 %v1562_v2  ;;  %v1575_v20 = vld [vmem:[%s1979_s9 + $0x38] sm:$0xff]   ;;  %v1581_v21 = vld [vmem:[#allocation5 + $0x50] sm:$0xff]   ;;  %v1582_v22 = vld [vmem:[#allocation5 + $0x48] sm:$0xff]   ;;  %p1751_p13 = scmp.lt.s32.totalorder %s2051_s28, %s1749_s22  ;;  %p1752_p0 = scmp.lt.s32.totalorder %s1750_s17, %s1744_s16 }
  0x5c   : > { %v1583_v23 = vld [vmem:[#allocation5 + $0x40] sm:$0xff]   ;;  %p1747_p12 = pneg %p1746_p7 }
  0x5d   : > { %1396 = vmatpush3.bf16.msra.mxu1 %v1577_v8  ;;  %v2000_v27 = vld [vmem:[#allocation7] sm:$0xf]  ;;  %p1753_p10 = por %p1752_p0, %p1751_p13 }
  0x5e   : > { %1366 = vmatpush3.bf16.msra.mxu0 %v1562_v2  ;;  %1397 = vmatprep.subr.bf16.mxu1 %v1578_v10  ;;  %v255_v29 = vrot.slane %v2000_v27, %v254_v26  ;;  %v1587_v24 = vld [vmem:[#allocation5 + $0xa0] sm:$0xff]   ;;  %v1588_v26 = vld [vmem:[#allocation5 + $0x98] sm:$0xff]  }
  0x5f   : > { %1367 = vmatprep.subr.bf16.mxu0 %v1563_v3  ;;  %p1754_p3 = pnand %p1753_p10, %p1747_p12 }
  0x61   : > { %1398 = vmatpush3.bf16.msra.mxu1 %v1578_v10 }
  0x62   : > { %1368 = vmatpush3.bf16.msra.mxu0 %v1563_v3  ;;  %1399 = vmatprep.subr.bf16.mxu1 %v1579_v12 }
  0x63   : > { %1369 = vmatprep.subr.bf16.mxu0 %v1564_v5 }
  0x65   : > { %1400 = vmatpush3.bf16.msra.mxu1 %v1579_v12 }
  0x66   : > { %1370 = vmatpush3.bf16.msra.mxu0 %v1564_v5  ;;  %1401 = vmatprep.subr.bf16.mxu1 %v1580_v13 }
  0x67   : > { %1371 = vmatprep.subr.bf16.mxu0 %v1565_v6 }
  0x69   : > { %1402 = vmatpush3.bf16.msra.mxu1 %v1580_v13 }
  0x6a   : > { %1372 = vmatpush3.bf16.msra.mxu0 %v1565_v6  ;;  %1403 = vmatprep.subr.bf16.mxu1 %v1581_v21 }
  0x6b   : > { %1373 = vmatprep.subr.bf16.mxu0 %v1566_v9 }
  0x6d   : > { %1404 = vmatpush3.bf16.msra.mxu1 %v1581_v21  ;;  %v1584_v21 = vld [vmem:[#allocation5 + $0xb8] sm:$0xff]  }
  0x6e   : > { %1374 = vmatpush3.bf16.msra.mxu0 %v1566_v9  ;;  %1405 = vmatprep.subr.bf16.mxu1 %v1582_v22 }
  0x6f   : > { %1375 = vmatprep.subr.bf16.mxu0 %v1567_v11 }
  0x71   : > { %1406 = vmatpush3.bf16.msra.mxu1 %v1582_v22  ;;  %v1585_v22 = vld [vmem:[#allocation5 + $0xb0] sm:$0xff]  }
  0x72   : > { %1376 = vmatpush3.bf16.msra.mxu0 %v1567_v11  ;;  %1407 = vmatprep.subr.bf16.mxu1 %v1583_v23 }
  0x73   : > { %1425 = vmatprep.subr.bf16.mxu0 %v1584_v21 }
  0x75   : > { %1378 = vmatmul.mubr.bf16.vlgmr.msra.gmra.mxu0 %v1569_v14  ;;  %1408 = vmatpush3.bf16.msra.mxu1 %v1583_v23  ;;  %v1586_v23 = vld [vmem:[#allocation5 + $0xa8] sm:$0xff]  }
  0x76   : > { %1381 = vmatprep.mubr.bf16.mxu0 %v1570_v15  ;;  %1426 = vmatpush3.bf16.msra.mxu0 %v1584_v21 }
  0x77   : > { %1427 = vmatprep.subr.bf16.mxu0 %v1585_v22 }
  0x7a   : > { %1428 = vmatpush3.bf16.msra.mxu0 %v1585_v22 }
  0x7b   : > { %1429 = vmatprep.subr.bf16.mxu0 %v1586_v23 }
  0x7d   : > { %1382 = vmatmul.mubr.bf16.gmra.mxu0 %v1571_v16 }
  0x7e   : > { %1385 = vmatprep.mubr.bf16.mxu0 %v1572_v17  ;;  %1430 = vmatpush3.bf16.msra.mxu0 %v1586_v23 }
  0x7f   : > { %1431 = vmatprep.subr.bf16.mxu0 %v1587_v24 }
  0x82   : > { %1432 = vmatpush3.bf16.msra.mxu0 %v1587_v24 }
  0x83   : > { %1433 = vmatprep.subr.bf16.mxu0 %v1588_v26 }
  0x85   : > { %1386 = vmatmul.mubr.bf16.gmra.mxu0 %v1573_v18 }
  0x86   : > { %1389 = vmatprep.mubr.bf16.mxu0 %v1574_v19  ;;  %1434 = vmatpush3.bf16.msra.mxu0 %v1588_v26 }
  0x8d   : > { %1390 = vmatmul.mubr.bf16.gmra.mxu0 %v1575_v20 }
 0x135   : > { %v1379_v28 = vpop.f32.mrf.mxu0 }
 0x136   : > { %v395_v34 = vadd.f32 %v1379_v28, %v255_v29  ;;  %v1589_v28 = vld [vmem:[#allocation5 + $0x90] sm:$0xff]  }
 0x137   : > { %v386_v30 = vpop.f32.mrf.mxu0  ;;  %1435 = vmatprep.subr.bf16.mxu0 %v1589_v28 }
 0x138   : > { %v387_v32 = vadd.f32 %v386_v30, %v255_v29  ;;  %v451_v41 = vmax.f32 %v395_v34, 0.0  ;;  %1436 = vmatpush3.bf16.msra.mxu0 %v1589_v28  ;;  %v1591_v30 = vld [vmem:[#allocation5 + $0x80] sm:$0xff]  }
 0x139   : > { %v1380_v31 = vpop.f32.mrf.mxu0  ;;  %v1595_v34 = vld [vmem:[#allocation5 + $0xe0] sm:$0xff]  }
 0x13a   : > { %v398_v33 = vadd.f32 %v1380_v31, %v255_v29  ;;  %v449_v39 = vmax.f32 %v387_v32, 0.0  ;;  %v1592_v31 = vld [vmem:[#allocation5 + $0xf8] sm:$0xff]   ;;  %v1593_v32 = vld [vmem:[#allocation5 + $0xf0] sm:$0xff]  }
 0x13b   : > { %v389_v35 = vpop.f32.mrf.mxu0  ;;  %1457 = vmatprep.subr.bf16.mxu1 %v1592_v31 }
 0x13c   : > { %v390_v36 = vadd.f32 %v389_v35, %v255_v29  ;;  %v452_v37 = vmax.f32 %v398_v33, 0.0  ;;  %v1594_v33 = vld [vmem:[#allocation5 + $0xe8] sm:$0xff]   ;;  %v1596_v35 = vld [vmem:[#allocation5 + $0xd8] sm:$0xff]  }
 0x13d   : > { %v1383_v38 = vpop.f32.mrf.mxu0 }
 0x13e   : > { %v450_v40 = vmax.f32 %v390_v36, 0.0  ;;  %v466_v44 = vpack.c.bf16 %v452_v37, %v451_v41  ;;  %v411_v48 = vadd.f32 %v1383_v38, %v255_v29  ;;  %v492_v36 = vsub.s32 1, %v1997_v25 }
 0x13f   : > { %v402_v42 = vpop.f32.mrf.mxu0 }
 0x140   : > { %v465_v43 = vpack.c.bf16 %v450_v40, %v449_v39  ;;  %v403_v46 = vadd.f32 %v402_v42, %v255_v29  ;;  %v455_v55 = vmax.f32 %v411_v48, 0.0  ;;  %v2005_v37 = vrot.slane %v2000_v27, %v492_v36 }
 0x141   : > { %v1384_v45 = vpop.f32.mrf.mxu0 }
 0x142   : > { %v414_v47 = vadd.f32 %v1384_v45, %v255_v29  ;;  %1409 = vmatprep.mubr.bf16.mxu1 %v465_v43  ;;  %v453_v53 = vmax.f32 %v403_v46, 0.0 }
 0x143   : > { %v405_v49 = vpop.f32.mrf.mxu0  ;;  %1410 = vmatmul.mubr.bf16.vlgmr.msra.gmra.mxu1 %v466_v44 }
 0x144   : > { %v406_v50 = vadd.f32 %v405_v49, %v255_v29  ;;  %v456_v51 = vmax.f32 %v414_v47, 0.0  ;;  %1458 = vmatpush3.bf16.msra.mxu1 %v1592_v31 }
 0x145   : > { %v1387_v52 = vpop.f32.mrf.mxu0  ;;  %1459 = vmatprep.subr.bf16.mxu1 %v1593_v32 }
 0x146   : > { %v454_v54 = vmax.f32 %v406_v50, 0.0  ;;  %v468_v58 = vpack.c.bf16 %v456_v51, %v455_v55  ;;  %v427_v62 = vadd.f32 %v1387_v52, %v255_v29 }
 0x147   : > { %v418_v56 = vpop.f32.mrf.mxu0 }
 0x148   : > { %v467_v57 = vpack.c.bf16 %v454_v54, %v453_v53  ;;  %v419_v60 = vadd.f32 %v418_v56, %v255_v29  ;;  %v459_v5 = vmax.f32 %v427_v62, 0.0  ;;  %1460 = vmatpush3.bf16.msra.mxu1 %v1593_v32 }
 0x149   : > { %v1388_v59 = vpop.f32.mrf.mxu0  ;;  %1461 = vmatprep.subr.bf16.mxu1 %v1594_v33 }
 0x14a   : > { %v430_v61 = vadd.f32 %v1388_v59, %v255_v29  ;;  %1413 = vmatprep.mubr.bf16.mxu1 %v467_v57  ;;  %v457_v3 = vmax.f32 %v419_v60, 0.0 }
 0x14b   : > { %v421_v63 = vpop.f32.mrf.mxu0  ;;  %1414 = vmatmul.mubr.bf16.gmra.mxu1 %v468_v58 }
 0x14c   : > { %v422_v0 = vadd.f32 %v421_v63, %v255_v29  ;;  %v460_v1 = vmax.f32 %v430_v61, 0.0  ;;  %1462 = vmatpush3.bf16.msra.mxu1 %v1594_v33 }
 0x14d   : > { %v1391_v2 = vpop.f32.mrf.mxu0  ;;  %1463 = vmatprep.subr.bf16.mxu1 %v1595_v34 }
 0x14e   : > { %v458_v4 = vmax.f32 %v422_v0, 0.0  ;;  %v470_v8 = vpack.c.bf16 %v460_v1, %v459_v5  ;;  %v443_v12 = vadd.f32 %v1391_v2, %v255_v29 }
 0x14f   : > { %v434_v6 = vpop.f32.mrf.mxu0 }
 0x150   : > { %v469_v7 = vpack.c.bf16 %v458_v4, %v457_v3  ;;  %v435_v10 = vadd.f32 %v434_v6, %v255_v29  ;;  %v463_v18 = vmax.f32 %v443_v12, 0.0  ;;  %1464 = vmatpush3.bf16.msra.mxu1 %v1595_v34 }
 0x151   : > { %v1392_v9 = vpop.f32.mrf.mxu0  ;;  %1465 = vmatprep.subr.bf16.mxu1 %v1596_v35 }
 0x152   : > { %v446_v11 = vadd.f32 %v1392_v9, %v255_v29  ;;  %1417 = vmatprep.mubr.bf16.mxu1 %v469_v7  ;;  %v461_v16 = vmax.f32 %v435_v10, 0.0 }
 0x153   : > { %v437_v13 = vpop.f32.mrf.mxu0  ;;  %1418 = vmatmul.mubr.bf16.gmra.mxu1 %v470_v8 }
 0x154   : > { %v438_v14 = vadd.f32 %v437_v13, %v255_v29  ;;  %v464_v15 = vmax.f32 %v446_v11, 0.0  ;;  %v1590_v29 = vld [vmem:[#allocation5 + $0x88] sm:$0xff]   ;;  %1466 = vmatpush3.bf16.msra.mxu1 %v1596_v35 }
 0x155   : > { %1437 = vmatprep.subr.bf16.mxu0 %v1590_v29 }
 0x156   : > { %v462_v17 = vmax.f32 %v438_v14, 0.0  ;;  %v472_v20 = vpack.c.bf16 %v464_v15, %v463_v18  ;;  %1438 = vmatpush3.bf16.msra.mxu0 %v1590_v29 }
 0x157   : > { %1439 = vmatprep.subr.bf16.mxu0 %v1591_v30 }
 0x158   : > { %v471_v19 = vpack.c.bf16 %v462_v17, %v461_v16 }
 0x15a   : > { %1421 = vmatprep.mubr.bf16.mxu1 %v471_v19  ;;  %1440 = vmatpush3.bf16.msra.mxu0 %v1591_v30 }
 0x15b   : > { %1422 = vmatmul.mubr.bf16.gmra.mxu1 %v472_v20 }
 0x203   : > { %v1411_v38 = vpop.f32.mrf.mxu1 }
 0x204   : > { %v585_v39 = vadd.f32 %v1411_v38, %v2005_v37 }
 0x205   : > { %v576_v40 = vpop.f32.mrf.mxu1 }
 0x206   : > { %v1260_v41 = vmul.f32 -1.442695, %v585_v39  ;;  %v577_v42 = vadd.f32 %v576_v40, %v2005_v37 }
 0x207   : > { %v1412_v43 = vpop.f32.mrf.mxu1 }
 0x208   : > { %1600 = vpow2.f32 %v1260_v41  ;;  %v1258_v44 = vmul.f32 -1.442695, %v577_v42  ;;  %v588_v45 = vadd.f32 %v1412_v43, %v2005_v37 }
 0x209   : > { %v579_v46 = vpop.f32.mrf.mxu1 }
 0x20a   : > { %1602 = vpow2.f32 %v1258_v44  ;;  %v1261_v47 = vmul.f32 -1.442695, %v588_v45  ;;  %v580_v48 = vadd.f32 %v579_v46, %v2005_v37 }
 0x20b   : > { %v1415_v49 = vpop.f32.mrf.mxu1 }
 0x20c   : > { %1604 = vpow2.f32 %v1261_v47  ;;  %v1259_v50 = vmul.f32 -1.442695, %v580_v48  ;;  %v601_v51 = vadd.f32 %v1415_v49, %v2005_v37 }
 0x20d   : > { %v592_v52 = vpop.f32.mrf.mxu1 }
 0x20e   : > { %1606 = vpow2.f32 %v1259_v50  ;;  %v1264_v53 = vmul.f32 -1.442695, %v601_v51  ;;  %v593_v54 = vadd.f32 %v592_v52, %v2005_v37 }
 0x20f   : > { %v1416_v55 = vpop.f32.mrf.mxu1 }
 0x210   : > { %1608 = vpow2.f32 %v1264_v53  ;;  %v1262_v56 = vmul.f32 -1.442695, %v593_v54  ;;  %v604_v57 = vadd.f32 %v1416_v55, %v2005_v37 }
 0x211   : > { %v595_v58 = vpop.f32.mrf.mxu1 }
 0x212   : > { %1610 = vpow2.f32 %v1262_v56  ;;  %v1265_v59 = vmul.f32 -1.442695, %v604_v57  ;;  %v596_v60 = vadd.f32 %v595_v58, %v2005_v37 }
 0x213   : > { %v1419_v61 = vpop.f32.mrf.mxu1 }
 0x214   : > { %1612 = vpow2.f32 %v1265_v59  ;;  %v1263_v62 = vmul.f32 -1.442695, %v596_v60  ;;  %v617_v63 = vadd.f32 %v1419_v61, %v2005_v37 }
 0x215   : > { %v1601_v0 = vpop.eup %1600  ;;  %v608_v1 = vpop.f32.mrf.mxu1 }
 0x216   : > { %v689_v2 = vadd.f32 1.0, %v1601_v0  ;;  %1614 = vpow2.f32 %v1263_v62  ;;  %v1268_v3 = vmul.f32 -1.442695, %v617_v63  ;;  %v609_v4 = vadd.f32 %v608_v1, %v2005_v37 }
 0x217   : > { %v1603_v5 = vpop.eup %1602  ;;  %v1420_v6 = vpop.f32.mrf.mxu1 }
 0x218   : > { %1616 = vrcp.f32 %v689_v2  ;;  %v687_v7 = vadd.f32 1.0, %v1603_v5  ;;  %v1266_v8 = vmul.f32 -1.442695, %v609_v4  ;;  %v620_v9 = vadd.f32 %v1420_v6, %v2005_v37 }
 0x219   : > { %v1605_v10 = vpop.eup %1604  ;;  %1618 = vpow2.f32 %v1268_v3  ;;  %v611_v11 = vpop.f32.mrf.mxu1 }
 0x21a   : > { %1620 = vrcp.f32 %v687_v7  ;;  %v690_v12 = vadd.f32 1.0, %v1605_v10  ;;  %v1269_v13 = vmul.f32 -1.442695, %v620_v9  ;;  %v612_v14 = vadd.f32 %v611_v11, %v2005_v37 }
 0x21b   : > { %v1607_v15 = vpop.eup %1606  ;;  %1622 = vpow2.f32 %v1266_v8  ;;  %v1423_v16 = vpop.f32.mrf.mxu1 }
 0x21c   : > { %1624 = vrcp.f32 %v690_v12  ;;  %v688_v17 = vadd.f32 1.0, %v1607_v15  ;;  %v1267_v18 = vmul.f32 -1.442695, %v612_v14  ;;  %v633_v19 = vadd.f32 %v1423_v16, %v2005_v37  ;;  %v1597_v16 = vld [vmem:[#allocation5 + $0xd0] sm:$0xff]  }
 0x21d   : > { %v1609_v20 = vpop.eup %1608  ;;  %1626 = vpow2.f32 %v1269_v13  ;;  %v624_v21 = vpop.f32.mrf.mxu1  ;;  %1467 = vmatprep.subr.bf16.mxu1 %v1597_v16 }
 0x21e   : > { %1628 = vrcp.f32 %v688_v17  ;;  %v693_v22 = vadd.f32 1.0, %v1609_v20  ;;  %v1272_v23 = vmul.f32 -1.442695, %v633_v19  ;;  %v625_v24 = vadd.f32 %v624_v21, %v2005_v37  ;;  %1468 = vmatpush3.bf16.msra.mxu1 %v1597_v16  ;;  %v1598_v17 = vld [vmem:[#allocation5 + $0xc8] sm:$0xff]  }
 0x21f   : > { %v1611_v26 = vpop.eup %1610  ;;  %1630 = vpow2.f32 %v1267_v18  ;;  %v1424_v28 = vpop.f32.mrf.mxu1  ;;  %1469 = vmatprep.subr.bf16.mxu1 %v1598_v17  ;;  %v1599_v18 = vld [vmem:[#allocation5 + $0xc0] sm:$0xff]   ;;  %v762_v19 = vsub.s32 2, %v1997_v25 }
 0x220   : > { %1632 = vrcp.f32 %v693_v22  ;;  %v691_v29 = vadd.f32 1.0, %v1611_v26  ;;  %v1270_v30 = vmul.f32 -1.442695, %v625_v24  ;;  %v636_v31 = vadd.f32 %v1424_v28, %v2005_v37 }
 0x221   : > { %v1613_v32 = vpop.eup %1612  ;;  %1634 = vpow2.f32 %v1272_v23  ;;  %v627_v33 = vpop.f32.mrf.mxu1  ;;  %v763_v21 = vrot.slane %v2000_v27, %v762_v19 }
 0x222   : > { %1636 = vrcp.f32 %v691_v29  ;;  %v694_v34 = vadd.f32 1.0, %v1613_v32  ;;  %v1273_v35 = vmul.f32 -1.442695, %v636_v31  ;;  %v628_v36 = vadd.f32 %v627_v33, %v2005_v37  ;;  %1470 = vmatpush3.bf16.msra.mxu1 %v1598_v17 }
 0x223   : > { %v1615_v38 = vpop.eup %1614  ;;  %1638 = vpow2.f32 %v1270_v30  ;;  %1471 = vmatprep.subr.bf16.mxu1 %v1599_v18 }
 0x224   : > { %1640 = vrcp.f32 %v694_v34  ;;  %v692_v39 = vadd.f32 1.0, %v1615_v38  ;;  %v1271_v40 = vmul.f32 -1.442695, %v628_v36 }
 0x225   : > { %v1617_v41 = vpop.eup %1616  ;;  %1642 = vpow2.f32 %v1273_v35 }
 0x226   : > { %v1619_v42 = vpop.eup %1618  ;;  %1644 = vrcp.f32 %v692_v39  ;;  %1472 = vmatpush3.bf16.msra.mxu1 %v1599_v18 }
 0x227   : > { %v1621_v43 = vpop.eup %1620  ;;  %1646 = vpow2.f32 %v1271_v40  ;;  %v697_v51 = vadd.f32 1.0, %v1619_v42 }
 0x228   : > { %v1623_v44 = vpop.eup %1622 }
 0x229   : > { %v1625_v45 = vpop.eup %1624  ;;  %v695_v46 = vadd.f32 1.0, %v1623_v44 }
 0x22a   : > { %v1627_v47 = vpop.eup %1626  ;;  %v736_v54 = vpack.c.bf16 %v1625_v45, %v1617_v41 }
 0x22b   : > { %v1629_v48 = vpop.eup %1628  ;;  %v698_v49 = vadd.f32 1.0, %v1627_v47  ;;  %1648 = vrcp.f32 %v695_v46 }
 0x22c   : > { %v1631_v50 = vpop.eup %1630  ;;  %v735_v37 = vpack.c.bf16 %v1629_v48, %v1621_v43 }
 0x22d   : > { %v1633_v52 = vpop.eup %1632  ;;  %v696_v53 = vadd.f32 1.0, %v1631_v50  ;;  %1650 = vrcp.f32 %v698_v49 }
 0x22e   : > { %v1635_v55 = vpop.eup %1634  ;;  %1441 = vmatprep.mubr.bf16.mxu0 %v735_v37 }
 0x22f   : > { %v1637_v56 = vpop.eup %1636  ;;  %1652 = vrcp.f32 %v696_v53  ;;  %1442 = vmatmul.mubr.bf16.vlgmr.msra.gmra.mxu0 %v736_v54  ;;  %v701_v0 = vadd.f32 1.0, %v1635_v55 }
 0x230   : > { %v1639_v57 = vpop.eup %1638  ;;  %1654 = vrcp.f32 %v697_v51 }
 0x231   : > { %v1641_v58 = vpop.eup %1640  ;;  %v699_v59 = vadd.f32 1.0, %v1639_v57 }
 0x232   : > { %v1643_v60 = vpop.eup %1642  ;;  %v738_v3 = vpack.c.bf16 %v1641_v58, %v1633_v52 }
 0x233   : > { %v1645_v61 = vpop.eup %1644  ;;  %v702_v62 = vadd.f32 1.0, %v1643_v60  ;;  %1656 = vrcp.f32 %v699_v59 }
 0x234   : > { %v1647_v63 = vpop.eup %1646  ;;  %v737_v1 = vpack.c.bf16 %v1645_v61, %v1637_v56 }
 0x235   : > { %v700_v2 = vadd.f32 1.0, %v1647_v63  ;;  %1658 = vrcp.f32 %v702_v62 }
 0x236   : > { %1445 = vmatprep.mubr.bf16.mxu0 %v737_v1 }
 0x237   : > { %1660 = vrcp.f32 %v700_v2  ;;  %1446 = vmatmul.mubr.bf16.gmra.mxu0 %v738_v3 }
 0x238   : > { %1662 = vrcp.f32 %v701_v0  ;;  %v1649_v4 = vpop.eup %1648 }
 0x23a   : > { %v1651_v5 = vpop.eup %1650 }
 0x23c   : > { %v1653_v6 = vpop.eup %1652 }
 0x23d   : > { %v1655_v7 = vpop.eup %1654  ;;  %v739_v8 = vpack.c.bf16 %v1653_v6, %v1649_v4 }
 0x23e   : > { %v740_v9 = vpack.c.bf16 %v1651_v5, %v1655_v7 }
 0x23f   : > { %1449 = vmatprep.mubr.bf16.mxu0 %v739_v8 }
 0x240   : > { %1450 = vmatmul.mubr.bf16.gmra.mxu0 %v740_v9  ;;  %v1657_v10 = vpop.eup %1656 }
 0x242   : > { %v1659_v11 = vpop.eup %1658 }
 0x244   : > { %v1661_v12 = vpop.eup %1660 }
 0x245   : > { %v1663_v13 = vpop.eup %1662  ;;  %v741_v14 = vpack.c.bf16 %v1661_v12, %v1657_v10 }
 0x246   : > { %v742_v15 = vpack.c.bf16 %v1659_v11, %v1663_v13 }
 0x247   : > { %1453 = vmatprep.mubr.bf16.mxu0 %v741_v14 }
 0x248   : > { %1454 = vmatmul.mubr.bf16.gmra.mxu0 %v742_v15  ;;  %v952_v15 = vsub.s32 3, %v1997_v25 }
 0x24a   : > { %v953_v16 = vrot.slane %v2000_v27, %v952_v15 }
 0x2ef   : > { %v1443_v20 = vpop.f32.mrf.mxu0 }
 0x2f0   : > { %v855_v28 = vadd.f32 %v1443_v20, %v763_v21 }
 0x2f1   : > { %v846_v22 = vpop.f32.mrf.mxu0 }
 0x2f2   : > { %v847_v24 = vadd.f32 %v846_v22, %v763_v21  ;;  %v911_v35 = vmax.f32 %v855_v28, 0.0 }
 0x2f3   : > { %v1444_v23 = vpop.f32.mrf.mxu0 }
 0x2f4   : > { %v858_v26 = vadd.f32 %v1444_v23, %v763_v21  ;;  %v909_v33 = vmax.f32 %v847_v24, 0.0 }
 0x2f5   : > { %v849_v29 = vpop.f32.mrf.mxu0 }
 0x2f6   : > { %v850_v30 = vadd.f32 %v849_v29, %v763_v21  ;;  %v912_v31 = vmax.f32 %v858_v26, 0.0 }
 0x2f7   : > { %v1447_v32 = vpop.f32.mrf.mxu0 }
 0x2f8   : > { %v910_v34 = vmax.f32 %v850_v30, 0.0  ;;  %v926_v39 = vpack.c.bf16 %v912_v31, %v911_v35  ;;  %v871_v43 = vadd.f32 %v1447_v32, %v763_v21 }
 0x2f9   : > { %v862_v36 = vpop.f32.mrf.mxu0 }
 0x2fa   : > { %v925_v38 = vpack.c.bf16 %v910_v34, %v909_v33  ;;  %v863_v41 = vadd.f32 %v862_v36, %v763_v21  ;;  %v915_v50 = vmax.f32 %v871_v43, 0.0 }
 0x2fb   : > { %v1448_v40 = vpop.f32.mrf.mxu0 }
 0x2fc   : > { %v874_v42 = vadd.f32 %v1448_v40, %v763_v21  ;;  %1473 = vmatprep.mubr.bf16.mxu1 %v925_v38  ;;  %v913_v47 = vmax.f32 %v863_v41, 0.0 }
 0x2fd   : > { %v865_v44 = vpop.f32.mrf.mxu0  ;;  %1474 = vmatmul.mubr.bf16.vlgmr.msra.gmra.mxu1 %v926_v39 }
 0x2fe   : > { %v866_v45 = vadd.f32 %v865_v44, %v763_v21  ;;  %v916_v46 = vmax.f32 %v874_v42, 0.0 }
 0x300   : > { %v914_v48 = vmax.f32 %v866_v45, 0.0  ;;  %v1451_v49 = vpop.f32.mrf.mxu0  ;;  %v928_v52 = vpack.c.bf16 %v916_v46, %v915_v50 }
 0x301   : > { %v887_v56 = vadd.f32 %v1451_v49, %v763_v21 }
 0x302   : > { %v927_v51 = vpack.c.bf16 %v914_v48, %v913_v47  ;;  %v878_v37 = vpop.f32.mrf.mxu0 }
 0x303   : > { %v879_v54 = vadd.f32 %v878_v37, %v763_v21  ;;  %v919_v63 = vmax.f32 %v887_v56, 0.0 }
 0x304   : > { %v1452_v53 = vpop.f32.mrf.mxu0  ;;  %1477 = vmatprep.mubr.bf16.mxu1 %v927_v51 }
 0x305   : > { %v890_v55 = vadd.f32 %v1452_v53, %v763_v21  ;;  %1478 = vmatmul.mubr.bf16.gmra.mxu1 %v928_v52  ;;  %v917_v61 = vmax.f32 %v879_v54, 0.0 }
 0x306   : > { %v881_v57 = vpop.f32.mrf.mxu0 }
 0x307   : > { %v882_v58 = vadd.f32 %v881_v57, %v763_v21  ;;  %v920_v59 = vmax.f32 %v890_v55, 0.0 }
 0x308   : > { %v1455_v60 = vpop.f32.mrf.mxu0 }
 0x309   : > { %v918_v62 = vmax.f32 %v882_v58, 0.0  ;;  %v930_v2 = vpack.c.bf16 %v920_v59, %v919_v63  ;;  %v903_v6 = vadd.f32 %v1455_v60, %v763_v21 }
 0x30a   : > { %v894_v0 = vpop.f32.mrf.mxu0 }
 0x30b   : > { %v929_v1 = vpack.c.bf16 %v918_v62, %v917_v61  ;;  %v895_v4 = vadd.f32 %v894_v0, %v763_v21  ;;  %v923_v12 = vmax.f32 %v903_v6, 0.0 }
 0x30c   : > { %v1456_v3 = vpop.f32.mrf.mxu0 }
 0x30d   : > { %v906_v5 = vadd.f32 %v1456_v3, %v763_v21  ;;  %1481 = vmatprep.mubr.bf16.mxu1 %v929_v1  ;;  %v921_v10 = vmax.f32 %v895_v4, 0.0 }
 0x30e   : > { %v897_v7 = vpop.f32.mrf.mxu0  ;;  %1482 = vmatmul.mubr.bf16.gmra.mxu1 %v930_v2 }
 0x30f   : > { %v898_v8 = vadd.f32 %v897_v7, %v763_v21  ;;  %v924_v9 = vmax.f32 %v906_v5, 0.0 }
 0x311   : > { %v922_v11 = vmax.f32 %v898_v8, 0.0  ;;  %v932_v14 = vpack.c.bf16 %v924_v9, %v923_v12 }
 0x313   : > { %v931_v13 = vpack.c.bf16 %v922_v11, %v921_v10 }
 0x315   : > { %1485 = vmatprep.mubr.bf16.mxu1 %v931_v13 }
 0x316   : > { %1486 = vmatmul.mubr.bf16.gmra.mxu1 %v932_v14 }
 0x3bd   : > { %v1475_v17 = vpop.f32.mrf.mxu1 }
 0x3be   : > { %v1045_v18 = vadd.f32 %v1475_v17, %v953_v16 }
 0x3bf   : > { %v1036_v19 = vpop.f32.mrf.mxu1 }
 0x3c0   : > { %1101 = vst [vmem:[%s2028_s20 + $0x10] sm:$0xff] %v1045_v18  ;;  %v1037_v20 = vadd.f32 %v1036_v19, %v953_v16 }
 0x3c1   : > { %v1476_v21 = vpop.f32.mrf.mxu1 }
 0x3c2   : > { %1099 = vst [vmem:[%s2028_s20] sm:$0xff] %v1037_v20  ;;  %v1048_v25 = vadd.f32 %v1476_v21, %v953_v16 }
 0x3c3   : > { %v1039_v22 = vpop.f32.mrf.mxu1 }
 0x3c4   : > { %1102 = vst [vmem:[%s2028_s20 + $0x18] sm:$0xff] %v1048_v25  ;;  %v1040_v27 = vadd.f32 %v1039_v22, %v953_v16 }
 0x3c5   : > { %v1479_v23 = vpop.f32.mrf.mxu1 }
 0x3c6   : > { %1100 = vst [vmem:[%s2028_s20 + $0x8] sm:$0xff] %v1040_v27  ;;  %v1061_v24 = vadd.f32 %v1479_v23, %v953_v16 }
 0x3c7   : > { %v1052_v26 = vpop.f32.mrf.mxu1 }
 0x3c8   : > { %1105 = vst [vmem:[%s2028_s20 + $0x30] sm:$0xff] %v1061_v24  ;;  %v1053_v28 = vadd.f32 %v1052_v26, %v953_v16 }
 0x3c9   : > { %v1480_v29 = vpop.f32.mrf.mxu1 }
 0x3ca   : > { %1103 = vst [vmem:[%s2028_s20 + $0x20] sm:$0xff] %v1053_v28  ;;  %v1064_v30 = vadd.f32 %v1480_v29, %v953_v16 }
 0x3cb   : > { %v1055_v31 = vpop.f32.mrf.mxu1 }
 0x3cc   : > { %1106 = vst [vmem:[%s2028_s20 + $0x38] sm:$0xff] %v1064_v30  ;;  %v1056_v32 = vadd.f32 %v1055_v31, %v953_v16 }
 0x3ce   : > { %1104 = vst [vmem:[%s2028_s20 + $0x28] sm:$0xff] %v1056_v32  ;;  %v1483_v33 = vpop.f32.mrf.mxu1 }
 0x3cf   : > { %v1077_v34 = vadd.f32 %v1483_v33, %v953_v16 }
 0x3d0   : > { %v1068_v35 = vpop.f32.mrf.mxu1 }
 0x3d1   : > { %1109 = vst [vmem:[%s2028_s20 + $0x50] sm:$0xff] %v1077_v34  ;;  %v1069_v36 = vadd.f32 %v1068_v35, %v953_v16 }
 0x3d2   : > { %v1484_v38 = vpop.f32.mrf.mxu1 }
 0x3d3   : > { %1107 = vst [vmem:[%s2028_s20 + $0x40] sm:$0xff] %v1069_v36  ;;  %v1080_v39 = vadd.f32 %v1484_v38, %v953_v16 }
 0x3d4   : > { %v1071_v40 = vpop.f32.mrf.mxu1 }
 0x3d5   : > { %1110 = vst [vmem:[%s2028_s20 + $0x58] sm:$0xff] %v1080_v39  ;;  %v1072_v41 = vadd.f32 %v1071_v40, %v953_v16 }
 0x3d6   : > { %v1487_v42 = vpop.f32.mrf.mxu1 }
 0x3d7   : > { %1108 = vst [vmem:[%s2028_s20 + $0x48] sm:$0xff] %v1072_v41  ;;  %v1093_v43 = vadd.f32 %v1487_v42, %v953_v16 }
 0x3d8   : > { %v1084_v44 = vpop.f32.mrf.mxu1 }
 0x3d9   : > { %1113 = vst [vmem:[%s2028_s20 + $0x70] sm:$0xff] %v1093_v43  ;;  %v1085_v45 = vadd.f32 %v1084_v44, %v953_v16 }
 0x3da   : > { %v1488_v46 = vpop.f32.mrf.mxu1 }
 0x3db   : > { %1111 = vst [vmem:[%s2028_s20 + $0x60] sm:$0xff] %v1085_v45  ;;  %v1096_v47 = vadd.f32 %v1488_v46, %v953_v16 }
 0x3dc   : > { %v1087_v48 = vpop.f32.mrf.mxu1 }
 0x3dd   : > { %1114 = vst [vmem:[%s2028_s20 + $0x78] sm:$0xff] %v1096_v47  ;;  %v1088_v49 = vadd.f32 %v1087_v48, %v953_v16 }
 0x3df   : > { %1112 = vst [vmem:[%s2028_s20 + $0x68] sm:$0xff] %v1088_v49 }
 0x3e0   : > { %1757 = shalt.err (!%p1754_p3)
}
 0x3e1   : > { %s1758_s23 = scalar_lea.hbm %s2049_s30, 2048  ;;  %s1762_s6 = scalar_lea.hbm %s2099_s3, 4096 }
 0x3e2   : > { %p1759_p11 = scmp.ne.s32.totalorder %s2049_s30, %s1758_s23  ;;  %p1763_p4 = scmp.lt.s32.totalorder %s2049_s30, %s2099_s3 }
 0x3e3   : > { %p1764_p6 = scmp.lt.s32.totalorder %s1762_s6, %s1758_s23 }
 0x3e4   : > { %p1760_p9 = pnand %p1759_p11, %p2114_p2 }
 0x3e5   : > { %p1765_p8 = por %p1764_p6, %p1763_p4 }
 0x3e6   : > { %p1761_p1 = pneg %p1760_p9 }
 0x3e8   : > { %p1766_p5 = pnand %p1765_p8, %p1761_p1 }
 0x3ea   : > { %1769 = shalt.err (!%p1766_p5)
}
 0x3eb   : > { %s1820_s18 = smov 128   ;;  %s1821_s20 = smov 8  }
 0x3ec   : > { %1499 = dma.vmem_to_hbm [thread:$0]  (%p2114_p2), %s2051_s28, 2048, %s2049_s30, %s1116_s4, %s1820_s18, %s1820_s18, %s1821_s20  }
 0x3ed PF: > { %s1144_s27 = sand.u32 1, %s1800_s12   ;;  %p2115_p7 = scmp.ne.s32.totalorder %s2105_s19, 0 }
 0x3ee   : > { %p2116_p12 = scmp.ge.s32.totalorder %s1812_s15, 2  ;;  %s1145_s25 = scalar_lea.sflag [#allocation4], %s1144_s27 }
 0x3f0   : > { %p1513_p13 = pnand %p2116_p12, %p2115_p7 }
 0x3f2   : > { %p1514_p0 = pneg %p1513_p13 }
 0x3f4   : > { %1795 = dma.done.wait (%p1514_p0), %s1145_s25, 2048  }
 0x3f5   : > { %1797 = vsyncadd (%p1514_p0), %s1145_s25, 4294965248  ;;  %p17_p10 = scmp.ge.s32.totalorder %s1917_s7, 4   ;;  %s2117_s12 = smov %s1804_s13 }
 0x3f6   : > { %s2118_s13 = smov %s1808_s14  ;;  %s2119_s14 = smov %s1933_s11 }
 0x3f7   : > { %s2120_s15 = smov %s1917_s7  ;;  %19 = sbr.rel (!%p17_p10) target bundleno = 6 (0x6), region = 88 }
 0x3fc   :  { %1150 = vsyncpa [#allocation3], 1 }
 0x3fd   :  { %1152 = vsyncpa [#allocation3 + $0x1], 1 }
 0x3fe   :  { %1153 = vsyncpa [#allocation6], 1 }
 0x3ff   :  { %1154 = vsyncpa [#allocation4], 1 }
 0x400   :  { %1156 = vsyncpa [#allocation4 + $0x1], 1 }

</bundles_post_ra>
